<compile_context>
chip_gen: v6e
topology: v6e:2x2x1
jax: 0.10.0
libtpu: 0.0.40
codegen_flags: <defaults>
</compile_context>

<pallas_src>
import functools

import jax
import jax.numpy as jnp
from jax.experimental import pallas as pl
from jax.experimental.pallas import tpu as pltpu

LANE = 128


def ivae_kernel(
    x_ref, u_ref, eps_ref,
    wx1_ref, bx1_ref, wxmv_ref, bxmv_ref,
    wu1_ref, bu1_ref, wumv_ref, bumv_ref,
    wd1_ref, bd1_ref, wd2_ref, bd2_ref,
    y_ref, loss_ref,
    *, x_dim, lat_pad,
):
    x = x_ref[...]
    u = u_ref[...]
    eps = eps_ref[...]
    batch = x.shape[0]
    inv_b = 1.0 / batch

    # ---- encoder for x: fused (z_mean || z_logvar) head -> one MXU push ----
    hx = jnp.tanh(
        jnp.dot(x, wx1_ref[...], preferred_element_type=jnp.float32) + bx1_ref[...]
    )
    zmv = jnp.dot(hx, wxmv_ref[...], preferred_element_type=jnp.float32) + bxmv_ref[...]
    z_mean = zmv[:, :lat_pad]
    z_logvar = zmv[:, lat_pad:]

    # ---- encoder (label prior) for u: fused (lam_mean || lam_logvar) head ----
    hu = jnp.tanh(
        jnp.dot(u, wu1_ref[...], preferred_element_type=jnp.float32) + bu1_ref[...]
    )
    lmv = jnp.dot(hu, wumv_ref[...], preferred_element_type=jnp.float32) + bumv_ref[...]
    lam_mean = lmv[:, :lat_pad]
    lam_logvar = lmv[:, lat_pad:]

    # ---- reparameterize: z = mu + exp(0.5 * logvar) * eps ----
    z = z_mean + jnp.exp(0.5 * z_logvar) * eps

    # ---- decoder (GIN stand-in MLP): firing-rate logits y ----
    hd = jnp.tanh(
        jnp.dot(z, wd1_ref[...], preferred_element_type=jnp.float32) + bd1_ref[...]
    )
    y = jnp.dot(hd, wd2_ref[...], preferred_element_type=jnp.float32) + bd2_ref[...]
    y_ref[...] = y

    # ---- reconstruction loss (obs_dist='gaussian'):
    #      sigmoid(logits), sum-of-squares MSE, divided by batch size ----
    fr = jax.nn.sigmoid(y)
    diff = fr - x
    if x_dim != y.shape[-1]:  # mask padded output lanes (trace-time branch)
        lane_x = jax.lax.broadcasted_iota(jnp.int32, diff.shape, 1)
        diff = jnp.where(lane_x < x_dim, diff, 0.0)
    recon = jnp.sum(diff * diff, axis=(0, 1), keepdims=True) * inv_b  # (1, 1)

    # ---- KL divergence between q(z|x) and p(z|u) ----
    # Division by exp(lam_logvar) rewritten as exp(z_lv - lam_lv) and
    # exp(-lam_lv): moves work to the EUP slot and avoids exp-then-divide.
    # Padded latent lanes (all zeros) contribute 1 + 0 - 0 - exp(0) - 0 = 0.
    dmean = z_mean - lam_mean
    kl = (
        1.0
        + z_logvar
        - lam_logvar
        - jnp.exp(z_logvar - lam_logvar)
        - dmean * dmean * jnp.exp(-lam_logvar)
    )
    kl_loss = jnp.sum(kl, axis=(0, 1), keepdims=True) * (-0.5 * inv_b)  # (1, 1)

    # ---- single lane-dense loss output: lane 0 = recon, lane 1 = kl ----
    lane = jax.lax.broadcasted_iota(jnp.int32, loss_ref.shape, 1)
    loss_ref[...] = jnp.where(lane == 0, recon, 0.0) + jnp.where(lane == 1, kl_loss, 0.0)


def _ceil_to(n, m):
    return ((n + m - 1) // m) * m


def _pad2(a, rows, cols):
    return jnp.pad(a, ((0, rows - a.shape[0]), (0, cols - a.shape[1])))


@jax.jit
def ivae_forward(x, u, eps, params):
    """Run the fused IVAE forward. Returns (y, recon_loss, kl_loss)."""
    batch, x_dim = x.shape
    u_dim = u.shape[1]
    latent = eps.shape[1]
    hidden = params["wx1"].shape[1]

    # Lane-pad every feature dim to a multiple of 128 (zero padding).
    Xp = _ceil_to(x_dim, LANE)
    Up = _ceil_to(u_dim, LANE)
    Hp = _ceil_to(hidden, LANE)
    Lp = _ceil_to(latent, LANE)

    xp = _pad2(x, batch, Xp)
    up = _pad2(u, batch, Up)
    epsp = _pad2(eps, batch, Lp)

    wx1 = _pad2(params["wx1"], Xp, Hp)
    bx1 = _pad2(params["bx1"], 1, Hp)
    # fused mean/logvar heads: (Hp, 2*Lp)
    wxmv = jnp.concatenate(
        [_pad2(params["wxm"], Hp, Lp), _pad2(params["wxv"], Hp, Lp)], axis=1)
    bxmv = jnp.concatenate(
        [_pad2(params["bxm"], 1, Lp), _pad2(params["bxv"], 1, Lp)], axis=1)

    wu1 = _pad2(params["wu1"], Up, Hp)
    bu1 = _pad2(params["bu1"], 1, Hp)
    wumv = jnp.concatenate(
        [_pad2(params["wum"], Hp, Lp), _pad2(params["wuv"], Hp, Lp)], axis=1)
    bumv = jnp.concatenate(
        [_pad2(params["bum"], 1, Lp), _pad2(params["buv"], 1, Lp)], axis=1)

    wd1 = _pad2(params["wd1"], Lp, Hp)
    bd1 = _pad2(params["bd1"], 1, Hp)
    wd2 = _pad2(params["wd2"], Hp, Xp)
    bd2 = _pad2(params["bd2"], 1, Xp)

    args = (xp, up, epsp,
            wx1, bx1, wxmv, bxmv,
            wu1, bu1, wumv, bumv,
            wd1, bd1, wd2, bd2)

    vmem = pltpu.MemorySpace.VMEM
    y_full, losses = pl.pallas_call(
        functools.partial(ivae_kernel, x_dim=x_dim, lat_pad=Lp),
        out_shape=(
            jax.ShapeDtypeStruct((batch, Xp), jnp.float32),  # y (logits, padded)
            jax.ShapeDtypeStruct((1, LANE), jnp.float32),    # [recon, kl, 0, ...]
        ),
        in_specs=[pl.BlockSpec(memory_space=vmem)] * len(args),
        out_specs=(
            pl.BlockSpec(memory_space=vmem),
            pl.BlockSpec(memory_space=vmem),
        ),
    )(*args)

    y = y_full[:, :x_dim]
    return y, losses[0, 0], losses[0, 1]


def init_params(key, x_dim, u_dim, hidden, latent):
    """Deterministic synthetic parameter init (matches MLP encoder/decoder shapes)."""
    ks = jax.random.split(key, 10)
    s = 0.1

    def w(k, shape):
        return jax.random.normal(k, shape, dtype=jnp.float32) * s

    return {
        # encoder-x MLP: x -> hidden -> (z_mean, z_logvar)
        "wx1": w(ks[0], (x_dim, hidden)), "bx1": jnp.zeros((1, hidden), jnp.float32),
        "wxm": w(ks[1], (hidden, latent)), "bxm": jnp.zeros((1, latent), jnp.float32),
        "wxv": w(ks[2], (hidden, latent)), "bxv": jnp.zeros((1, latent), jnp.float32),
        # encoder-u MLP (label prior): u -> hidden -> (lam_mean, lam_logvar)
        "wu1": w(ks[3], (u_dim, hidden)), "bu1": jnp.zeros((1, hidden), jnp.float32),
        "wum": w(ks[4], (hidden, latent)), "bum": jnp.zeros((1, latent), jnp.float32),
        "wuv": w(ks[5], (hidden, latent)), "buv": jnp.zeros((1, latent), jnp.float32),
        # decoder MLP: z -> hidden -> x_dim (firing-rate logits)
        "wd1": w(ks[6], (latent, hidden)), "bd1": jnp.zeros((1, hidden), jnp.float32),
        "wd2": w(ks[7], (hidden, x_dim)), "bd2": jnp.zeros((1, x_dim), jnp.float32),
    }


if __name__ == "__main__":
    BATCH, X_DIM, U_DIM, HIDDEN, LATENT = 8, 128, 8, 64, 16

    key = jax.random.PRNGKey(0)
    k_x, k_u, k_eps, k_params = jax.random.split(key, 4)

    # data (e.g. binned firing rates in [0,1]) and task variable u
    x = jax.random.uniform(k_x, (BATCH, X_DIM), dtype=jnp.float32)
    u = jax.random.normal(k_u, (BATCH, U_DIM), dtype=jnp.float32)
    # reparameterization noise (torch.randn equivalent, fixed for determinism)
    eps = jax.random.normal(k_eps, (BATCH, LATENT), dtype=jnp.float32)

    params = init_params(k_params, X_DIM, U_DIM, HIDDEN, LATENT)

    y, recon_loss, kl_loss = ivae_forward(x, u, eps, params)
    jax.block_until_ready((y, recon_loss, kl_loss))

    assert y.shape == (BATCH, X_DIM)
    assert recon_loss.shape == () and kl_loss.shape == ()
    assert bool(jnp.isfinite(recon_loss)) and bool(jnp.isfinite(kl_loss))
    print("KERNEL_OK")
</pallas_src>

<mosaic_0001>
module attributes {stable_mosaic.version = 11 : i64} {
  func.func @ivae_kernel(%arg0: memref<8x128xf32, #tpu.memory_space<vmem>>, %arg1: memref<8x128xf32, #tpu.memory_space<vmem>>, %arg2: memref<8x128xf32, #tpu.memory_space<vmem>>, %arg3: memref<128x128xf32, #tpu.memory_space<vmem>>, %arg4: memref<1x128xf32, #tpu.memory_space<vmem>>, %arg5: memref<128x256xf32, #tpu.memory_space<vmem>>, %arg6: memref<1x256xf32, #tpu.memory_space<vmem>>, %arg7: memref<128x128xf32, #tpu.memory_space<vmem>>, %arg8: memref<1x128xf32, #tpu.memory_space<vmem>>, %arg9: memref<128x256xf32, #tpu.memory_space<vmem>>, %arg10: memref<1x256xf32, #tpu.memory_space<vmem>>, %arg11: memref<128x128xf32, #tpu.memory_space<vmem>>, %arg12: memref<1x128xf32, #tpu.memory_space<vmem>>, %arg13: memref<128x128xf32, #tpu.memory_space<vmem>>, %arg14: memref<1x128xf32, #tpu.memory_space<vmem>>, %arg15: memref<8x128xf32, #tpu.memory_space<vmem>>, %arg16: memref<1x128xf32, #tpu.memory_space<vmem>>) attributes {dimension_semantics = [], scalar_prefetch = 0 : i64, scratch_operands = 0 : i64, tpu.core_type = #tpu.core_type<tc>} {
    %c0 = arith.constant 0 : index
    %c0_0 = arith.constant 0 : index
    %0 = vector.load %arg0[%c0, %c0_0] : memref<8x128xf32, #tpu.memory_space<vmem>>, vector<8x128xf32>
    %c0_1 = arith.constant 0 : index
    %c0_2 = arith.constant 0 : index
    %1 = vector.load %arg1[%c0_1, %c0_2] : memref<8x128xf32, #tpu.memory_space<vmem>>, vector<8x128xf32>
    %c0_3 = arith.constant 0 : index
    %c0_4 = arith.constant 0 : index
    %2 = vector.load %arg2[%c0_3, %c0_4] : memref<8x128xf32, #tpu.memory_space<vmem>>, vector<8x128xf32>
    %c0_5 = arith.constant 0 : index
    %c0_6 = arith.constant 0 : index
    %3 = vector.load %arg3[%c0_5, %c0_6] : memref<128x128xf32, #tpu.memory_space<vmem>>, vector<128x128xf32>
    %cst = arith.constant dense<0.000000e+00> : vector<8x128xf32>
    %4 = tpu.matmul %0, %3, %cst {dimension_numbers = #tpu.dot_dimension_numbers<[1], [0], [0], [1], [0, 0, 1, 1], [], []>} : vector<8x128xf32>, vector<128x128xf32>, vector<8x128xf32> -> vector<8x128xf32>
    %c0_7 = arith.constant 0 : index
    %c0_8 = arith.constant 0 : index
    %5 = vector.load %arg4[%c0_7, %c0_8] : memref<1x128xf32, #tpu.memory_space<vmem>>, vector<1x128xf32>
    %6 = vector.broadcast %5 : vector<1x128xf32> to vector<8x128xf32>
    %7 = arith.addf %4, %6 : vector<8x128xf32>
    %8 = math.tanh %7 : vector<8x128xf32>
    %c0_9 = arith.constant 0 : index
    %c0_10 = arith.constant 0 : index
    %9 = vector.load %arg5[%c0_9, %c0_10] : memref<128x256xf32, #tpu.memory_space<vmem>>, vector<128x256xf32>
    %cst_11 = arith.constant dense<0.000000e+00> : vector<8x256xf32>
    %10 = tpu.matmul %8, %9, %cst_11 {dimension_numbers = #tpu.dot_dimension_numbers<[1], [0], [0], [1], [0, 0, 1, 1], [], []>} : vector<8x128xf32>, vector<128x256xf32>, vector<8x256xf32> -> vector<8x256xf32>
    %c0_12 = arith.constant 0 : index
    %c0_13 = arith.constant 0 : index
    %11 = vector.load %arg6[%c0_12, %c0_13] : memref<1x256xf32, #tpu.memory_space<vmem>>, vector<1x256xf32>
    %12 = vector.broadcast %11 : vector<1x256xf32> to vector<8x256xf32>
    %13 = arith.addf %10, %12 : vector<8x256xf32>
    %14 = vector.extract_strided_slice %13 {offsets = [0, 0], sizes = [8, 128], strides = [1, 1]} : vector<8x256xf32> to vector<8x128xf32>
    %15 = vector.extract_strided_slice %13 {offsets = [0, 128], sizes = [8, 128], strides = [1, 1]} : vector<8x256xf32> to vector<8x128xf32>
    %c0_14 = arith.constant 0 : index
    %c0_15 = arith.constant 0 : index
    %16 = vector.load %arg7[%c0_14, %c0_15] : memref<128x128xf32, #tpu.memory_space<vmem>>, vector<128x128xf32>
    %cst_16 = arith.constant dense<0.000000e+00> : vector<8x128xf32>
    %17 = tpu.matmul %1, %16, %cst_16 {dimension_numbers = #tpu.dot_dimension_numbers<[1], [0], [0], [1], [0, 0, 1, 1], [], []>} : vector<8x128xf32>, vector<128x128xf32>, vector<8x128xf32> -> vector<8x128xf32>
    %c0_17 = arith.constant 0 : index
    %c0_18 = arith.constant 0 : index
    %18 = vector.load %arg8[%c0_17, %c0_18] : memref<1x128xf32, #tpu.memory_space<vmem>>, vector<1x128xf32>
    %19 = vector.broadcast %18 : vector<1x128xf32> to vector<8x128xf32>
    %20 = arith.addf %17, %19 : vector<8x128xf32>
    %21 = math.tanh %20 : vector<8x128xf32>
    %c0_19 = arith.constant 0 : index
    %c0_20 = arith.constant 0 : index
    %22 = vector.load %arg9[%c0_19, %c0_20] : memref<128x256xf32, #tpu.memory_space<vmem>>, vector<128x256xf32>
    %cst_21 = arith.constant dense<0.000000e+00> : vector<8x256xf32>
    %23 = tpu.matmul %21, %22, %cst_21 {dimension_numbers = #tpu.dot_dimension_numbers<[1], [0], [0], [1], [0, 0, 1, 1], [], []>} : vector<8x128xf32>, vector<128x256xf32>, vector<8x256xf32> -> vector<8x256xf32>
    %c0_22 = arith.constant 0 : index
    %c0_23 = arith.constant 0 : index
    %24 = vector.load %arg10[%c0_22, %c0_23] : memref<1x256xf32, #tpu.memory_space<vmem>>, vector<1x256xf32>
    %25 = vector.broadcast %24 : vector<1x256xf32> to vector<8x256xf32>
    %26 = arith.addf %23, %25 : vector<8x256xf32>
    %27 = vector.extract_strided_slice %26 {offsets = [0, 0], sizes = [8, 128], strides = [1, 1]} : vector<8x256xf32> to vector<8x128xf32>
    %28 = vector.extract_strided_slice %26 {offsets = [0, 128], sizes = [8, 128], strides = [1, 1]} : vector<8x256xf32> to vector<8x128xf32>
    %cst_24 = arith.constant 5.000000e-01 : f32
    %29 = vector.broadcast %cst_24 : f32 to vector<8x128xf32>
    %30 = arith.mulf %29, %15 : vector<8x128xf32>
    %31 = math.exp %30 : vector<8x128xf32>
    %32 = arith.mulf %31, %2 : vector<8x128xf32>
    %33 = arith.addf %14, %32 : vector<8x128xf32>
    %c0_25 = arith.constant 0 : index
    %c0_26 = arith.constant 0 : index
    %34 = vector.load %arg11[%c0_25, %c0_26] : memref<128x128xf32, #tpu.memory_space<vmem>>, vector<128x128xf32>
    %cst_27 = arith.constant dense<0.000000e+00> : vector<8x128xf32>
    %35 = tpu.matmul %33, %34, %cst_27 {dimension_numbers = #tpu.dot_dimension_numbers<[1], [0], [0], [1], [0, 0, 1, 1], [], []>} : vector<8x128xf32>, vector<128x128xf32>, vector<8x128xf32> -> vector<8x128xf32>
    %c0_28 = arith.constant 0 : index
    %c0_29 = arith.constant 0 : index
    %36 = vector.load %arg12[%c0_28, %c0_29] : memref<1x128xf32, #tpu.memory_space<vmem>>, vector<1x128xf32>
    %37 = vector.broadcast %36 : vector<1x128xf32> to vector<8x128xf32>
    %38 = arith.addf %35, %37 : vector<8x128xf32>
    %39 = math.tanh %38 : vector<8x128xf32>
    %c0_30 = arith.constant 0 : index
    %c0_31 = arith.constant 0 : index
    %40 = vector.load %arg13[%c0_30, %c0_31] : memref<128x128xf32, #tpu.memory_space<vmem>>, vector<128x128xf32>
    %cst_32 = arith.constant dense<0.000000e+00> : vector<8x128xf32>
    %41 = tpu.matmul %39, %40, %cst_32 {dimension_numbers = #tpu.dot_dimension_numbers<[1], [0], [0], [1], [0, 0, 1, 1], [], []>} : vector<8x128xf32>, vector<128x128xf32>, vector<8x128xf32> -> vector<8x128xf32>
    %c0_33 = arith.constant 0 : index
    %c0_34 = arith.constant 0 : index
    %42 = vector.load %arg14[%c0_33, %c0_34] : memref<1x128xf32, #tpu.memory_space<vmem>>, vector<1x128xf32>
    %43 = vector.broadcast %42 : vector<1x128xf32> to vector<8x128xf32>
    %44 = arith.addf %41, %43 : vector<8x128xf32>
    %c0_35 = arith.constant 0 : index
    %c0_36 = arith.constant 0 : index
    %45 = vector.load %arg15[%c0_35, %c0_36] : memref<8x128xf32, #tpu.memory_space<vmem>>, vector<8x128xf32>
    tpu.vector_store %arg15[%c0_35, %c0_36], %44 {strides = array<i32>} : memref<8x128xf32, #tpu.memory_space<vmem>>, vector<8x128xf32>,
    %46 = arith.negf %44 : vector<8x128xf32>
    %47 = math.exp %46 : vector<8x128xf32>
    %cst_37 = arith.constant 1.000000e+00 : f32
    %48 = vector.broadcast %cst_37 : f32 to vector<8x128xf32>
    %49 = arith.addf %48, %47 : vector<8x128xf32>
    %50 = arith.divf %48, %49 : vector<8x128xf32>
    %51 = arith.subf %50, %0 : vector<8x128xf32>
    %52 = arith.mulf %51, %51 : vector<8x128xf32>
    %53 = vector.shape_cast %52 : vector<8x128xf32> to vector<1x8x128xf32>
    %cst_38 = arith.constant dense<0.000000e+00> : vector<1xf32>
    %54 = vector.multi_reduction <add>, %53, %cst_38 [1, 2] : vector<1x8x128xf32> to vector<1xf32>
    %55 = vector.shape_cast %54 : vector<1xf32> to vector<1x1x1xf32>
    %56 = vector.extract %55[0, 0, 0] : f32 from vector<1x1x1xf32>
    %57 = vector.broadcast %56 : f32 to vector<1x1xf32>
    %cst_39 = arith.constant 1.250000e-01 : f32
    %58 = vector.broadcast %cst_39 : f32 to vector<1x1xf32>
    %59 = arith.mulf %57, %58 : vector<1x1xf32>
    %60 = arith.subf %14, %27 : vector<8x128xf32>
    %cst_40 = arith.constant 1.000000e+00 : f32
    %61 = vector.broadcast %cst_40 : f32 to vector<8x128xf32>
    %62 = arith.addf %61, %15 : vector<8x128xf32>
    %63 = arith.subf %62, %28 : vector<8x128xf32>
    %64 = arith.subf %15, %28 : vector<8x128xf32>
    %65 = math.exp %64 : vector<8x128xf32>
    %66 = arith.subf %63, %65 : vector<8x128xf32>
    %67 = arith.mulf %60, %60 : vector<8x128xf32>
    %cst_41 = arith.constant 0.000000e+00 : f32
    %68 = vector.broadcast %cst_41 : f32 to vector<8x128xf32>
    %69 = arith.subf %68, %28 : vector<8x128xf32>
    %70 = math.exp %69 : vector<8x128xf32>
    %71 = arith.mulf %67, %70 : vector<8x128xf32>
    %72 = arith.subf %66, %71 : vector<8x128xf32>
    %73 = vector.shape_cast %72 : vector<8x128xf32> to vector<1x8x128xf32>
    %cst_42 = arith.constant dense<0.000000e+00> : vector<1xf32>
    %74 = vector.multi_reduction <add>, %73, %cst_42 [1, 2] : vector<1x8x128xf32> to vector<1xf32>
    %75 = vector.shape_cast %74 : vector<1xf32> to vector<1x1x1xf32>
    %76 = vector.extract %75[0, 0, 0] : f32 from vector<1x1x1xf32>
    %77 = vector.broadcast %76 : f32 to vector<1x1xf32>
    %cst_43 = arith.constant -6.250000e-02 : f32
    %78 = vector.broadcast %cst_43 : f32 to vector<1x1xf32>
    %79 = arith.mulf %77, %78 : vector<1x1xf32>
    %80 = tpu.iota {dimensions = array<i32: 1>} : vector<1x128xi32>
    %c0_i32 = arith.constant 0 : i32
    %81 = vector.broadcast %c0_i32 : i32 to vector<1x128xi32>
    %82 = arith.cmpi eq, %80, %81 : vector<1x128xi32>
    %cst_44 = arith.constant 0.000000e+00 : f32
    %83 = vector.shape_cast %59 : vector<1x1xf32> to vector<1x1xf32>
    %84 = vector.broadcast %83 : vector<1x1xf32> to vector<1x128xf32>
    %85 = vector.broadcast %cst_44 : f32 to vector<1x128xf32>
    %86 = arith.select %82, %84, %85 : vector<1x128xi1>, vector<1x128xf32>
    %c1_i32 = arith.constant 1 : i32
    %87 = vector.broadcast %c1_i32 : i32 to vector<1x128xi32>
    %88 = arith.cmpi eq, %80, %87 : vector<1x128xi32>
    %cst_45 = arith.constant 0.000000e+00 : f32
    %89 = vector.shape_cast %79 : vector<1x1xf32> to vector<1x1xf32>
    %90 = vector.broadcast %89 : vector<1x1xf32> to vector<1x128xf32>
    %91 = vector.broadcast %cst_45 : f32 to vector<1x128xf32>
    %92 = arith.select %88, %90, %91 : vector<1x128xi1>, vector<1x128xf32>
    %93 = arith.addf %86, %92 : vector<1x128xf32>
    %c0_46 = arith.constant 0 : index
    %c0_47 = arith.constant 0 : index
    %94 = vector.load %arg16[%c0_46, %c0_47] : memref<1x128xf32, #tpu.memory_space<vmem>>, vector<1x128xf32>
    tpu.vector_store %arg16[%c0_46, %c0_47], %93 {strides = array<i32>} : memref<1x128xf32, #tpu.memory_space<vmem>>, vector<1x128xf32>,
    return
  }
}

</mosaic_0001>

<bundles_post_ra>
// kernel: ivae_forward.1
= control target key start
LH: loop header
LB: loop body
LE: loop exit
PB: predicated region body
PF: predicated region fallthrough
CT: control target
= control target key end

     0   :  { %s1579_s0 = inlined_call_operand.vmem [shape: f32[8,128], index: 0, kind: input, shape index: {}]   ;;  %s1580_s1 = inlined_call_operand.vmem [shape: f32[8,128], index: 1, kind: input, shape index: {}]   ;;  %s1581_s2 = inlined_call_operand.vmem [shape: f32[8,128], index: 2, kind: input, shape index: {}]   ;;  %s1582_s3 = inlined_call_operand.vmem [shape: f32[128,128], index: 3, kind: input, shape index: {}]   ;;  %s1583_s4 = inlined_call_operand.vmem [shape: f32[1,128], index: 4, kind: input, shape index: {}]   ;;  %s1584_s5 = inlined_call_operand.vmem [shape: f32[128,256], index: 5, kind: input, shape index: {}]   ;;  %s1585_s6 = inlined_call_operand.vmem [shape: f32[1,256], index: 6, kind: input, shape index: {}]   ;;  %s1586_s7 = inlined_call_operand.vmem [shape: f32[128,128], index: 7, kind: input, shape index: {}]   ;;  %s1587_s8 = inlined_call_operand.vmem [shape: f32[1,128], index: 8, kind: input, shape index: {}]   ;;  %s1588_s9 = inlined_call_operand.vmem [shape: f32[128,256], index: 9, kind: input, shape index: {}]   ;;  %s1589_s10 = inlined_call_operand.vmem [shape: f32[1,256], index: 10, kind: input, shape index: {}]   ;;  %s1590_s11 = inlined_call_operand.vmem [shape: f32[128,128], index: 11, kind: input, shape index: {}]   ;;  %s1591_s12 = inlined_call_operand.vmem [shape: f32[1,128], index: 12, kind: input, shape index: {}]   ;;  %s1592_s13 = inlined_call_operand.vmem [shape: f32[128,128], index: 13, kind: input, shape index: {}]   ;;  %s1593_s14 = inlined_call_operand.vmem [shape: f32[1,128], index: 14, kind: input, shape index: {}]   ;;  %s1594_s15 = inlined_call_operand.hbm [shape: f32[8,128], index: 15, kind: output, shape index: {0}]   ;;  %s1595_s16 = inlined_call_operand.vmem [shape: f32[1,128], index: 16, kind: output, shape index: {1}]  }
   0x1   :  { %1596 = sst [smem:[#allocation5_spill]] %s1579_s0 }
   0x2   :  { %v71_v0 = vld [vmem:[%s1582_s3 + $0x78] sm:$0xff]  ;;  %v994_v1 = vmov 0.0   ;;  %v70_v2 = vld [vmem:[%s1582_s3 + $0x70] sm:$0xff]  ;;  %vm995_vm0 = vmmov 0   ;;  %v69_v3 = vld [vmem:[%s1582_s3 + $0x68] sm:$0xff] }
   0x3   :  { %809 = vmatprep.subr.mxu0 %v994_v1  ;;  %841 = vmatprep.mubr.msk.f32.mxu0 %vm995_vm0, %v994_v1  ;;  %v68_v4 = vld [vmem:[%s1582_s3 + $0x60] sm:$0xff]  ;;  %v67_v5 = vld [vmem:[%s1582_s3 + $0x58] sm:$0xff]  ;;  %v66_v6 = vld [vmem:[%s1582_s3 + $0x50] sm:$0xff] }
   0x4   :  { %810 = vmatpush3.msra.mxu0 %v71_v0  ;;  %258 = vmatprep.mubr.f32.mxu1 %v994_v1  ;;  %v65_v7 = vld [vmem:[%s1582_s3 + $0x48] sm:$0xff]  ;;  %v181_v8 = vld [vmem:[%s1584_s5 + $0xf8] sm:$0xff]  ;;  %v180_v9 = vld [vmem:[%s1584_s5 + $0xf0] sm:$0xff] }
   0x5   :  { %811 = vmatprep.subr.mxu0 %v994_v1  ;;  %194 = vmatprep.subr.mxu1 %v181_v8  ;;  %v179_v10 = vld [vmem:[%s1584_s5 + $0xe8] sm:$0xff]  ;;  %v178_v11 = vld [vmem:[%s1584_s5 + $0xe0] sm:$0xff]  ;;  %v177_v13 = vld [vmem:[%s1584_s5 + $0xd8] sm:$0xff] }
   0x6   :  { %812 = vmatpush3.msra.mxu0 %v70_v2  ;;  %v64_v12 = vld [vmem:[%s1582_s3 + $0x40] sm:$0xff]  ;;  %195 = vmatpush1.msra.mxu1 %v180_v9  ;;  %v176_v14 = vld [vmem:[%s1584_s5 + $0xd0] sm:$0xff]  ;;  %v63_v15 = vld [vmem:[%s1582_s3 + $0x38] sm:$0xff] }
   0x7   :  { %813 = vmatprep.subr.mxu0 %v994_v1  ;;  %196 = vmatprep.subr.mxu1 %v179_v10  ;;  %v175_v16 = vld [vmem:[%s1584_s5 + $0xc8] sm:$0xff]  ;;  %v174_v17 = vld [vmem:[%s1584_s5 + $0xc0] sm:$0xff] }
   0x8   :  { %814 = vmatpush3.msra.mxu0 %v69_v3  ;;  %197 = vmatpush1.msra.mxu1 %v178_v11 }
   0x9   :  { %815 = vmatprep.subr.mxu0 %v994_v1  ;;  %198 = vmatprep.subr.mxu1 %v177_v13 }
   0xa   :  { %816 = vmatpush3.msra.mxu0 %v68_v4 }
   0xb   :  { %817 = vmatprep.subr.mxu0 %v994_v1 }
   0xc   :  { %818 = vmatpush3.msra.mxu0 %v67_v5 }
   0xd   :  { %819 = vmatprep.subr.mxu0 %v994_v1 }
   0xe   :  { %820 = vmatpush3.msra.mxu0 %v66_v6 }
   0xf   :  { %821 = vmatprep.subr.mxu0 %v994_v1 }
  0x10   :  { %822 = vmatpush3.msra.mxu0 %v65_v7 }
  0x11   :  { %823 = vmatprep.subr.mxu0 %v994_v1 }
  0x12   :  { %824 = vmatpush3.msra.mxu0 %v64_v12 }
  0x13   :  { %22 = vsyncpa [#allocation3], 0  ;;  %825 = vmatprep.subr.mxu0 %v994_v1  ;;  %v62_v18 = vld [vmem:[%s1582_s3 + $0x30] sm:$0xff]  ;;  %199 = vmatpush1.msra.mxu1 %v176_v14  ;;  %v173_v19 = vld [vmem:[%s1584_s5 + $0xb8] sm:$0xff]  ;;  %s1597_s25 = sld [smem:[#allocation5_spill]] }
  0x14   :  { %826 = vmatpush3.msra.mxu0 %v63_v15  ;;  %200 = vmatprep.subr.mxu1 %v175_v16  ;;  %v172_v20 = vld [vmem:[%s1584_s5 + $0xb0] sm:$0xff]  ;;  %v61_v21 = vld [vmem:[%s1582_s3 + $0x28] sm:$0xff]  ;;  %v170_v23 = vld [vmem:[%s1584_s5 + $0xa0] sm:$0xff] }
  0x15   :  { %827 = vmatprep.subr.mxu0 %v994_v1  ;;  %201 = vmatpush1.msra.mxu1 %v174_v17  ;;  %v171_v22 = vld [vmem:[%s1584_s5 + $0xa8] sm:$0xff]  ;;  %v60_v24 = vld [vmem:[%s1582_s3 + $0x20] sm:$0xff]  ;;  %v169_v25 = vld [vmem:[%s1584_s5 + $0x98] sm:$0xff] }
  0x16   :  { %828 = vmatpush3.msra.mxu0 %v62_v18  ;;  %202 = vmatprep.subr.mxu1 %v173_v19  ;;  %v168_v26 = vld [vmem:[%s1584_s5 + $0x90] sm:$0xff]  ;;  %v59_v27 = vld [vmem:[%s1582_s3 + $0x18] sm:$0xff]  ;;  %v167_v28 = vld [vmem:[%s1584_s5 + $0x88] sm:$0xff] }
  0x17   :  { %829 = vmatprep.subr.mxu0 %v994_v1  ;;  %203 = vmatpush1.msra.mxu1 %v172_v20  ;;  %v58_v29 = vld [vmem:[%s1582_s3 + $0x10] sm:$0xff]  ;;  %v57_v30 = vld [vmem:[%s1582_s3 + $0x8] sm:$0xff]  ;;  %v56_v31 = vld [vmem:[%s1582_s3] sm:$0xff] }
  0x18   :  { %830 = vmatpush3.msra.mxu0 %v61_v21  ;;  %204 = vmatprep.subr.mxu1 %v171_v22  ;;  %v280_v33 = vld [vmem:[%s1586_s7 + $0x78] sm:$0xff]  ;;  %v279_v34 = vld [vmem:[%s1586_s7 + $0x70] sm:$0xff]  ;;  %v278_v35 = vld [vmem:[%s1586_s7 + $0x68] sm:$0xff] }
  0x19   :  { %831 = vmatprep.subr.mxu0 %v994_v1  ;;  %205 = vmatpush1.msra.mxu1 %v170_v23  ;;  %v1196_v32 = vld [vmem:[%s1597_s25] sm:$0xff]  ;;  %v276_v37 = vld [vmem:[%s1586_s7 + $0x58] sm:$0xff]  ;;  %v275_v38 = vld [vmem:[%s1586_s7 + $0x50] sm:$0xff] }
  0x1a   :  { %832 = vmatpush3.msra.mxu0 %v60_v24  ;;  %206 = vmatprep.subr.mxu1 %v169_v25  ;;  %v277_v36 = vld [vmem:[%s1586_s7 + $0x60] sm:$0xff]  ;;  %v274_v39 = vld [vmem:[%s1586_s7 + $0x48] sm:$0xff]  ;;  %v272_v41 = vld [vmem:[%s1586_s7 + $0x38] sm:$0xff] }
  0x1b   :  { %833 = vmatprep.subr.mxu0 %v994_v1  ;;  %207 = vmatpush1.msra.mxu1 %v168_v26  ;;  %v273_v40 = vld [vmem:[%s1586_s7 + $0x40] sm:$0xff]  ;;  %v271_v42 = vld [vmem:[%s1586_s7 + $0x30] sm:$0xff]  ;;  %v270_v43 = vld [vmem:[%s1586_s7 + $0x28] sm:$0xff] }
  0x1c   :  { %834 = vmatpush3.msra.mxu0 %v59_v27  ;;  %208 = vmatprep.subr.mxu1 %v167_v28  ;;  %v269_v44 = vld [vmem:[%s1586_s7 + $0x20] sm:$0xff]  ;;  %v268_v45 = vld [vmem:[%s1586_s7 + $0x18] sm:$0xff]  ;;  %v267_v46 = vld [vmem:[%s1586_s7 + $0x10] sm:$0xff] }
  0x1d   :  { %835 = vmatprep.subr.mxu0 %v994_v1  ;;  %v266_v47 = vld [vmem:[%s1586_s7 + $0x8] sm:$0xff]  ;;  %v265_v48 = vld [vmem:[%s1586_s7] sm:$0xff]  ;;  %v165_v51 = vld [vmem:[%s1584_s5 + $0x78] sm:$0xff] }
  0x1e   :  { %836 = vmatpush3.msra.mxu0 %v58_v29  ;;  %v54_v49 = vld [vmem:[%s1580_s1] sm:$0xff]  ;;  %v164_v52 = vld [vmem:[%s1584_s5 + $0x70] sm:$0xff]  ;;  %v163_v53 = vld [vmem:[%s1584_s5 + $0x68] sm:$0xff] }
  0x1f   :  { %837 = vmatprep.subr.mxu0 %v994_v1  ;;  %v166_v50 = vld [vmem:[%s1584_s5 + $0x80] sm:$0xff]  ;;  %v161_v55 = vld [vmem:[%s1584_s5 + $0x58] sm:$0xff]  ;;  %v160_v56 = vld [vmem:[%s1584_s5 + $0x50] sm:$0xff] }
  0x20   :  { %838 = vmatpush3.msra.mxu0 %v57_v30  ;;  %209 = vmatpush1.msra.mxu1 %v166_v50  ;;  %v162_v54 = vld [vmem:[%s1584_s5 + $0x60] sm:$0xff]  ;;  %v159_v57 = vld [vmem:[%s1584_s5 + $0x48] sm:$0xff]  ;;  %v157_v59 = vld [vmem:[%s1584_s5 + $0x38] sm:$0xff] }
  0x21   :  { %839 = vmatprep.subr.mxu0 %v994_v1  ;;  %210 = vmatprep.subr.mxu1 %v165_v51  ;;  %v158_v58 = vld [vmem:[%s1584_s5 + $0x40] sm:$0xff]  ;;  %v156_v60 = vld [vmem:[%s1584_s5 + $0x30] sm:$0xff]  ;;  %v155_v61 = vld [vmem:[%s1584_s5 + $0x28] sm:$0xff] }
  0x22   :  { %840 = vmatpush3.msra.mxu0 %v56_v31  ;;  %211 = vmatpush1.msra.mxu1 %v164_v52  ;;  %v154_v62 = vld [vmem:[%s1584_s5 + $0x20] sm:$0xff]  ;;  %v153_v63 = vld [vmem:[%s1584_s5 + $0x18] sm:$0xff]  ;;  %v152_v0 = vld [vmem:[%s1584_s5 + $0x10] sm:$0xff] }
  0x23   :  { %842 = vmatmul.mubr.f32.vlgmr.msra.gmra.mxu0 %v1196_v32  ;;  %844 = vmatprep.subr.mxu0 %v994_v1  ;;  %v151_v2 = vld [vmem:[%s1584_s5 + $0x8] sm:$0xff]  ;;  %v150_v3 = vld [vmem:[%s1584_s5] sm:$0xff]  ;;  %v390_v4 = vld [vmem:[%s1588_s9 + $0xf8] sm:$0xff] }
  0x24   :  { %845 = vmatpush3.msra.mxu0 %v280_v33  ;;  %876 = vmatprep.mubr.msk.f32.mxu0 %vm995_vm0, %v994_v1  ;;  %v494_v5 = vld [vmem:[%s1590_s11 + $0x78] sm:$0xff]  ;;  %v493_v6 = vld [vmem:[%s1590_s11 + $0x70] sm:$0xff]  ;;  %v736_v7 = vld [vmem:[%s1583_s4] ss:$0 sm:$0xff] }
  0x25   :  { %846 = vmatprep.subr.mxu0 %v994_v1  ;;  %212 = vmatprep.subr.mxu1 %v163_v53  ;;  %v389_v11 = vld [vmem:[%s1588_s9 + $0xf0] sm:$0xff]  ;;  %v388_v13 = vld [vmem:[%s1588_s9 + $0xe8] sm:$0xff]  ;;  %v387_v14 = vld [vmem:[%s1588_s9 + $0xe0] sm:$0xff] }
  0x26   :  { %847 = vmatpush3.msra.mxu0 %v279_v34  ;;  %213 = vmatpush1.msra.mxu1 %v162_v54  ;;  %v386_v15 = vld [vmem:[%s1588_s9 + $0xd8] sm:$0xff]  ;;  %v385_v16 = vld [vmem:[%s1588_s9 + $0xd0] sm:$0xff]  ;;  %v384_v17 = vld [vmem:[%s1588_s9 + $0xc8] sm:$0xff] }
  0x27   :  { %848 = vmatprep.subr.mxu0 %v994_v1  ;;  %214 = vmatprep.subr.mxu1 %v161_v55  ;;  %v383_v18 = vld [vmem:[%s1588_s9 + $0xc0] sm:$0xff]  ;;  %v382_v19 = vld [vmem:[%s1588_s9 + $0xb8] sm:$0xff]  ;;  %v381_v20 = vld [vmem:[%s1588_s9 + $0xb0] sm:$0xff] }
  0x28   :  { %849 = vmatpush3.msra.mxu0 %v278_v35  ;;  %215 = vmatpush1.msra.mxu1 %v160_v56  ;;  %v380_v21 = vld [vmem:[%s1588_s9 + $0xa8] sm:$0xff]  ;;  %v379_v22 = vld [vmem:[%s1588_s9 + $0xa0] sm:$0xff]  ;;  %v378_v23 = vld [vmem:[%s1588_s9 + $0x98] sm:$0xff] }
  0x29   :  { %850 = vmatprep.subr.mxu0 %v994_v1  ;;  %216 = vmatprep.subr.mxu1 %v159_v57  ;;  %v377_v24 = vld [vmem:[%s1588_s9 + $0x90] sm:$0xff]  ;;  %v376_v25 = vld [vmem:[%s1588_s9 + $0x88] sm:$0xff]  ;;  %v375_v26 = vld [vmem:[%s1588_s9 + $0x80] sm:$0xff] }
  0x2a   :  { %851 = vmatpush3.msra.mxu0 %v277_v36  ;;  %217 = vmatpush1.msra.mxu1 %v158_v58  ;;  %v737_v27 = vld [vmem:[%s1587_s8] ss:$0 sm:$0xff]  ;;  %v374_v28 = vld [vmem:[%s1588_s9 + $0x78] sm:$0xff]  ;;  %v373_v29 = vld [vmem:[%s1588_s9 + $0x70] sm:$0xff] }
  0x2b   :  { %852 = vmatprep.subr.mxu0 %v994_v1  ;;  %218 = vmatprep.subr.mxu1 %v157_v59  ;;  %v372_v31 = vld [vmem:[%s1588_s9 + $0x68] sm:$0xff]  ;;  %v371_v34 = vld [vmem:[%s1588_s9 + $0x60] sm:$0xff]  ;;  %v370_v35 = vld [vmem:[%s1588_s9 + $0x58] sm:$0xff] }
  0x2c   :  { %853 = vmatpush3.msra.mxu0 %v276_v37  ;;  %219 = vmatpush1.msra.mxu1 %v156_v60  ;;  %v369_v37 = vld [vmem:[%s1588_s9 + $0x50] sm:$0xff]  ;;  %v491_v50 = vld [vmem:[%s1590_s11 + $0x60] sm:$0xff]  ;;  %v490_v51 = vld [vmem:[%s1590_s11 + $0x58] sm:$0xff] }
  0x2d   :  { %854 = vmatprep.subr.mxu0 %v994_v1  ;;  %220 = vmatprep.subr.mxu1 %v155_v61  ;;  %v489_v52 = vld [vmem:[%s1590_s11 + $0x50] sm:$0xff]  ;;  %v488_v53 = vld [vmem:[%s1590_s11 + $0x48] sm:$0xff]  ;;  %v487_v54 = vld [vmem:[%s1590_s11 + $0x40] sm:$0xff] }
  0x2e   :  { %855 = vmatpush3.msra.mxu0 %v275_v38  ;;  %221 = vmatpush1.msra.mxu1 %v154_v62  ;;  %v368_v38 = vld [vmem:[%s1588_s9 + $0x48] sm:$0xff]  ;;  %v486_v55 = vld [vmem:[%s1590_s11 + $0x38] sm:$0xff]  ;;  %v485_v56 = vld [vmem:[%s1590_s11 + $0x30] sm:$0xff] }
  0x2f   :  { %856 = vmatprep.subr.mxu0 %v994_v1  ;;  %222 = vmatprep.subr.mxu1 %v153_v63  ;;  %v484_v57 = vld [vmem:[%s1590_s11 + $0x28] sm:$0xff]  ;;  %v483_v58 = vld [vmem:[%s1590_s11 + $0x20] sm:$0xff]  ;;  %v482_v59 = vld [vmem:[%s1590_s11 + $0x18] sm:$0xff] }
  0x30   :  { %857 = vmatpush3.msra.mxu0 %v274_v39  ;;  %223 = vmatpush1.msra.mxu1 %v152_v0  ;;  %v367_v39 = vld [vmem:[%s1588_s9 + $0x40] sm:$0xff]  ;;  %v481_v60 = vld [vmem:[%s1590_s11 + $0x10] sm:$0xff]  ;;  %v480_v61 = vld [vmem:[%s1590_s11 + $0x8] sm:$0xff] }
  0x31   :  { %858 = vmatprep.subr.mxu0 %v994_v1  ;;  %224 = vmatprep.subr.mxu1 %v151_v2  ;;  %v479_v62 = vld [vmem:[%s1590_s11] sm:$0xff]  ;;  %v588_v63 = vld [vmem:[%s1592_s13 + $0x78] sm:$0xff]  ;;  %v587_v0 = vld [vmem:[%s1592_s13 + $0x70] sm:$0xff] }
  0x32   :  { %859 = vmatpush3.msra.mxu0 %v273_v40  ;;  %225 = vmatpush1.msra.mxu1 %v150_v3  ;;  %v366_v40 = vld [vmem:[%s1588_s9 + $0x38] sm:$0xff]  ;;  %v586_v2 = vld [vmem:[%s1592_s13 + $0x68] sm:$0xff]  ;;  %v585_v3 = vld [vmem:[%s1592_s13 + $0x60] sm:$0xff] }
  0x33   :  { %860 = vmatprep.subr.mxu0 %v994_v1  ;;  %403 = vmatprep.subr.mxu1 %v390_v4  ;;  %v584_v4 = vld [vmem:[%s1592_s13 + $0x58] sm:$0xff] }
  0x34   :  { %861 = vmatpush3.msra.mxu0 %v272_v41  ;;  %v365_v41 = vld [vmem:[%s1588_s9 + $0x30] sm:$0xff] }
  0x35   :  { %862 = vmatprep.subr.mxu0 %v994_v1 }
  0x36   :  { %863 = vmatpush3.msra.mxu0 %v271_v42  ;;  %v364_v42 = vld [vmem:[%s1588_s9 + $0x28] sm:$0xff] }
  0x37   :  { %864 = vmatprep.subr.mxu0 %v994_v1 }
  0x38   :  { %865 = vmatpush3.msra.mxu0 %v270_v43  ;;  %v363_v43 = vld [vmem:[%s1588_s9 + $0x20] sm:$0xff] }
  0x39   :  { %866 = vmatprep.subr.mxu0 %v994_v1 }
  0x3a   :  { %867 = vmatpush3.msra.mxu0 %v269_v44  ;;  %v362_v44 = vld [vmem:[%s1588_s9 + $0x18] sm:$0xff] }
  0x3b   :  { %868 = vmatprep.subr.mxu0 %v994_v1 }
  0x3c   :  { %869 = vmatpush3.msra.mxu0 %v268_v45  ;;  %v361_v45 = vld [vmem:[%s1588_s9 + $0x10] sm:$0xff] }
  0x3d   :  { %870 = vmatprep.subr.mxu0 %v994_v1 }
  0x3e   :  { %871 = vmatpush3.msra.mxu0 %v267_v46  ;;  %v360_v46 = vld [vmem:[%s1588_s9 + $0x8] sm:$0xff] }
  0x3f   :  { %872 = vmatprep.subr.mxu0 %v994_v1 }
  0x40   :  { %873 = vmatpush3.msra.mxu0 %v266_v47  ;;  %v359_v47 = vld [vmem:[%s1588_s9] sm:$0xff] }
  0x41   :  { %874 = vmatprep.subr.mxu0 %v994_v1 }
  0x42   :  { %875 = vmatpush3.msra.mxu0 %v265_v48 }
  0x43   :  { %877 = vmatmul.mubr.f32.vlgmr.msra.gmra.mxu0 %v54_v49  ;;  %879 = vmatprep.subr.mxu0 %v994_v1  ;;  %v492_v49 = vld [vmem:[%s1590_s11 + $0x68] sm:$0xff] }
  0x44   :  { %911 = vmatprep.mubr.msk.f32.mxu0 %vm995_vm0, %v994_v1  ;;  %880 = vmatpush3.msra.mxu0 %v494_v5  ;;  %v583_v5 = vld [vmem:[%s1592_s13 + $0x50] sm:$0xff] }
  0x45   :  { %881 = vmatprep.subr.mxu0 %v994_v1 }
  0x46   :  { %882 = vmatpush3.msra.mxu0 %v493_v6  ;;  %v582_v6 = vld [vmem:[%s1592_s13 + $0x48] sm:$0xff] }
  0x47   :  { %883 = vmatprep.subr.mxu0 %v994_v1 }
  0x48   :  { %884 = vmatpush3.msra.mxu0 %v492_v49  ;;  %v577_v49 = vld [vmem:[%s1592_s13 + $0x20] sm:$0xff] }
  0x49   :  { %885 = vmatprep.subr.mxu0 %v994_v1 }
  0x4a   :  { %886 = vmatpush3.msra.mxu0 %v491_v50  ;;  %v576_v50 = vld [vmem:[%s1592_s13 + $0x18] sm:$0xff] }
  0x4b   :  { %887 = vmatprep.subr.mxu0 %v994_v1 }
  0x4c   :  { %888 = vmatpush3.msra.mxu0 %v490_v51  ;;  %v575_v51 = vld [vmem:[%s1592_s13 + $0x10] sm:$0xff] }
  0x4d   :  { %889 = vmatprep.subr.mxu0 %v994_v1 }
  0x4e   :  { %890 = vmatpush3.msra.mxu0 %v489_v52  ;;  %v574_v52 = vld [vmem:[%s1592_s13 + $0x8] sm:$0xff] }
  0x4f   :  { %891 = vmatprep.subr.mxu0 %v994_v1 }
  0x50   :  { %892 = vmatpush3.msra.mxu0 %v488_v53  ;;  %v573_v53 = vld [vmem:[%s1592_s13] sm:$0xff] }
  0x51   :  { %893 = vmatprep.subr.mxu0 %v994_v1 }
  0x52   :  { %894 = vmatpush3.msra.mxu0 %v487_v54  ;;  %v738_v54 = vld [vmem:[%s1591_s12] ss:$0 sm:$0xff]  ;;  %s996_s12 = smov [#allocation2]  }
  0x53   :  { %895 = vmatprep.subr.mxu0 %v994_v1 }
  0x54   :  { %896 = vmatpush3.msra.mxu0 %v486_v55 }
  0x55   :  { %897 = vmatprep.subr.mxu0 %v994_v1 }
  0x56   :  { %898 = vmatpush3.msra.mxu0 %v485_v56 }
  0x57   :  { %899 = vmatprep.subr.mxu0 %v994_v1 }
  0x58   :  { %900 = vmatpush3.msra.mxu0 %v484_v57 }
  0x59   :  { %901 = vmatprep.subr.mxu0 %v994_v1 }
  0x5a   :  { %902 = vmatpush3.msra.mxu0 %v483_v58 }
  0x5b   :  { %903 = vmatprep.subr.mxu0 %v994_v1 }
  0x5c   :  { %904 = vmatpush3.msra.mxu0 %v482_v59  ;;  %v739_v59 = vld [vmem:[%s1593_s14] ss:$0 sm:$0xff] }
  0x5d   :  { %905 = vmatprep.subr.mxu0 %v994_v1 }
  0x5e   :  { %906 = vmatpush3.msra.mxu0 %v481_v60 }
  0x5f   :  { %907 = vmatprep.subr.mxu0 %v994_v1 }
  0x60   :  { %908 = vmatpush3.msra.mxu0 %v480_v61 }
  0x61   :  { %909 = vmatprep.subr.mxu0 %v994_v1 }
  0x62   :  { %910 = vmatpush3.msra.mxu0 %v479_v62 }
  0xe3   :  { %v145_v8 = vpop.f32.mrf.mxu0 }
  0xe4   :  { %v146_v9 = vadd.f32 %v736_v7, %v145_v8  ;;  %v184_v7 = vlaneseq }
  0xe5   :  { %v843_v10 = vpop.f32.mrf.mxu0 }
  0xe6   :  { %956 = vtanh.f32 %v146_v9  ;;  %v185_v8 = vshrl.u32 %v184_v7, 7  ;;  %v182_v10 = vld [vmem:[%s1585_s6] sm:$0x3] }
  0xe8   :  { %v190_v9 = vsub.s32 1, %v185_v8 }
  0xf3   :  { %v957_v12 = vpop.eup %956 }
  0xf4   :  { %259 = vmatmul.mubr.f32.vlgmr.msra.gmra.mxu1 %v957_v12 }
  0xf5   :  { %404 = vmatpush1.msra.mxu1 %v389_v11  ;;  %467 = vmatprep.mubr.f32.mxu1 %v994_v1  ;;  %v191_v11 = vrot.slane %v182_v10, %v190_v9 }
  0xf6   :  { %405 = vmatprep.subr.mxu1 %v388_v13 }
  0xf7   :  { %406 = vmatpush1.msra.mxu1 %v387_v14 }
  0xf8   :  { %407 = vmatprep.subr.mxu1 %v386_v15 }
  0xf9   :  { %408 = vmatpush1.msra.mxu1 %v385_v16 }
  0xfa   :  { %409 = vmatprep.subr.mxu1 %v384_v17  ;;  %v186_v17 = vsub.s32 0, %v185_v8 }
  0xfb   :  { %410 = vmatpush1.msra.mxu1 %v383_v18 }
  0xfc   :  { %411 = vmatprep.subr.mxu1 %v382_v19  ;;  %v187_v18 = vrot.slane %v182_v10, %v186_v17  ;;  %v55_v19 = vld [vmem:[%s1581_s2] sm:$0xff] }
  0xfd   :  { %412 = vmatpush1.msra.mxu1 %v381_v20 }
  0xfe   :  { %413 = vmatprep.subr.mxu1 %v380_v21 }
  0xff   :  { %414 = vmatpush1.msra.mxu1 %v379_v22 }
 0x100   :  { %415 = vmatprep.subr.mxu1 %v378_v23 }
 0x101   :  { %416 = vmatpush1.msra.mxu1 %v377_v24  ;;  %v391_v24 = vld [vmem:[%s1589_s10] sm:$0x3] }
 0x102   :  { %417 = vmatprep.subr.mxu1 %v376_v25  ;;  %v400_v25 = vrot.slane %v391_v24, %v190_v9 }
 0x103   :  { %v354_v30 = vpop.f32.mrf.mxu0  ;;  %418 = vmatpush1.msra.mxu1 %v375_v26 }
 0x104   :  { %v355_v33 = vadd.f32 %v737_v27, %v354_v30  ;;  %419 = vmatprep.subr.mxu1 %v374_v28 }
 0x105   :  { %420 = vmatpush1.msra.mxu1 %v373_v29  ;;  %v878_v36 = vpop.f32.mrf.mxu0 }
 0x106   :  { %958 = vtanh.f32 %v355_v33  ;;  %421 = vmatprep.subr.mxu1 %v372_v31  ;;  %v396_v36 = vrot.slane %v391_v24, %v186_v17 }
 0x107   :  { %422 = vmatpush1.msra.mxu1 %v371_v34 }
 0x108   :  { %423 = vmatprep.subr.mxu1 %v370_v35 }
 0x109   :  { %424 = vmatpush1.msra.mxu1 %v369_v37 }
 0x10a   :  { %425 = vmatprep.subr.mxu1 %v368_v38 }
 0x10b   :  { %426 = vmatpush1.msra.mxu1 %v367_v39 }
 0x10c   :  { %427 = vmatprep.subr.mxu1 %v366_v40 }
 0x10d   :  { %428 = vmatpush1.msra.mxu1 %v365_v41 }
 0x10e   :  { %429 = vmatprep.subr.mxu1 %v364_v42 }
 0x10f   :  { %430 = vmatpush1.msra.mxu1 %v363_v43 }
 0x110   :  { %431 = vmatprep.subr.mxu1 %v362_v44 }
 0x111   :  { %432 = vmatpush1.msra.mxu1 %v361_v45  ;;  %v581_v45 = vld [vmem:[%s1592_s13 + $0x40] sm:$0xff] }
 0x112   :  { %433 = vmatprep.subr.mxu1 %v360_v46  ;;  %v580_v46 = vld [vmem:[%s1592_s13 + $0x38] sm:$0xff] }
 0x113   :  { %v959_v48 = vpop.eup %958  ;;  %434 = vmatpush1.msra.mxu1 %v359_v47  ;;  %v579_v47 = vld [vmem:[%s1592_s13 + $0x30] sm:$0xff] }
 0x114   :  { %468 = vmatmul.mubr.f32.vlgmr.msra.gmra.mxu1 %v959_v48  ;;  %914 = vmatprep.subr.mxu1 %v994_v1  ;;  %v578_v48 = vld [vmem:[%s1592_s13 + $0x28] sm:$0xff]  ;;  %s724_s13 = sshll.u32 %s996_s12, 4  ;;  %s725_s13 = int_to_ptr.vmem [resolvable:$true] %s724_s13 }
 0x115   :  { %946 = vmatprep.mubr.msk.f32.mxu1 %vm995_vm0, %v994_v1  ;;  %915 = vmatpush3.msra.mxu1 %v588_v63  ;;  %s972_s0 = scalar_lea.vmem %s725_s13, 128  ;;  %p977_p1 = scmp.lt.s32.totalorder %s725_s13, %s725_s13 }
 0x116   :  { %916 = vmatprep.subr.mxu1 %v994_v1  ;;  %p973_p0 = scmp.ne.s32.totalorder %s725_s13, %s972_s0  ;;  %p978_p2 = scmp.lt.s32.totalorder %s972_s0, %s972_s0 }
 0x117   :  { %917 = vmatpush3.msra.mxu1 %v587_v0 }
 0x118   :  { %918 = vmatprep.subr.mxu1 %v994_v1  ;;  %p979_p3 = por %p978_p2, %p977_p1 }
 0x119   :  { %919 = vmatpush3.msra.mxu1 %v586_v2 }
 0x11a   :  { %920 = vmatprep.subr.mxu1 %v994_v1  ;;  %p980_p4 = pnand %p979_p3, %p973_p0 }
 0x11b   :  { %921 = vmatpush3.msra.mxu1 %v585_v3 }
 0x11c   :  { %922 = vmatprep.subr.mxu1 %v994_v1 }
 0x11d   :  { %923 = vmatpush3.msra.mxu1 %v584_v4 }
 0x11e   :  { %924 = vmatprep.subr.mxu1 %v994_v1 }
 0x11f   :  { %925 = vmatpush3.msra.mxu1 %v583_v5 }
 0x120   :  { %926 = vmatprep.subr.mxu1 %v994_v1 }
 0x121   :  { %927 = vmatpush3.msra.mxu1 %v582_v6 }
 0x122   :  { %928 = vmatprep.subr.mxu1 %v994_v1 }
 0x123   :  { %929 = vmatpush3.msra.mxu1 %v581_v45 }
 0x124   :  { %930 = vmatprep.subr.mxu1 %v994_v1 }
 0x125   :  { %931 = vmatpush3.msra.mxu1 %v580_v46 }
 0x126   :  { %932 = vmatprep.subr.mxu1 %v994_v1 }
 0x127   :  { %933 = vmatpush3.msra.mxu1 %v579_v47 }
 0x128   :  { %934 = vmatprep.subr.mxu1 %v994_v1 }
 0x129   :  { %935 = vmatpush3.msra.mxu1 %v578_v48 }
 0x12a   :  { %936 = vmatprep.subr.mxu1 %v994_v1 }
 0x12b   :  { %937 = vmatpush3.msra.mxu1 %v577_v49 }
 0x12c   :  { %938 = vmatprep.subr.mxu1 %v994_v1 }
 0x12d   :  { %939 = vmatpush3.msra.mxu1 %v576_v50 }
 0x12e   :  { %940 = vmatprep.subr.mxu1 %v994_v1 }
 0x12f   :  { %941 = vmatpush3.msra.mxu1 %v575_v51 }
 0x130   :  { %942 = vmatprep.subr.mxu1 %v994_v1 }
 0x131   :  { %943 = vmatpush3.msra.mxu1 %v574_v52 }
 0x132   :  { %944 = vmatprep.subr.mxu1 %v994_v1 }
 0x133   :  { %945 = vmatpush3.msra.mxu1 %v573_v53 }
 0x1b4   :  { %v260_v12 = vpop.f32.mrf.mxu1 }
 0x1b5   :  { %v261_v21 = vadd.f32 %v260_v12, %v187_v18 }
 0x1b6   :  { %v262_v13 = vpop.f32.mrf.mxu1 }
 0x1b7   :  { %v263_v14 = vadd.f32 %v262_v13, %v191_v11 }
 0x1b9   :  { %v474_v15 = vmul.f32 0.5, %v263_v14  ;;  %v687_v28 = vadd.f32 1.0, %v263_v14 }
 0x1bb   :  { %v475_v16 = vmul.f32 1.442695, %v474_v15 }
 0x1bd   :  { %960 = vpow2.f32 %v475_v16 }
 0x1ca   :  { %v961_v20 = vpop.eup %960 }
 0x1cb   :  { %v477_v22 = vmul.f32 %v961_v20, %v55_v19 }
 0x1cd   :  { %v478_v23 = vadd.f32 %v477_v22, %v261_v21 }
 0x1cf   :  { %912 = vmatmul.mubr.f32.vlgmr.msra.gmra.mxu0 %v478_v23 }
 0x1d4   :  { %v469_v26 = vpop.f32.mrf.mxu1 }
 0x1d5   :  { %v470_v37 = vadd.f32 %v469_v26, %v396_v36 }
 0x1d6   :  { %v471_v27 = vpop.f32.mrf.mxu1 }
 0x1d7   :  { %v472_v29 = vadd.f32 %v471_v27, %v400_v25  ;;  %v686_v38 = vsub.f32 %v261_v21, %v470_v37 }
 0x1d9   :  { %v688_v30 = vsub.f32 %v687_v28, %v472_v29  ;;  %v689_v31 = vsub.f32 %v263_v14, %v472_v29  ;;  %v694_v33 = vsub.f32 0.0, %v472_v29  ;;  %v693_v40 = vmul.f32 %v686_v38, %v686_v38 }
 0x1db   :  { %v690_v34 = vmul.f32 1.442695, %v689_v31  ;;  %v695_v35 = vmul.f32 1.442695, %v694_v33 }
 0x1dd   :  { %962 = vpow2.f32 %v690_v34 }
 0x1de   :  { %964 = vpow2.f32 %v695_v35 }
 0x1ea   :  { %v963_v39 = vpop.eup %962 }
 0x1eb   :  { %v965_v41 = vpop.eup %964  ;;  %v692_v42 = vsub.f32 %v688_v30, %v963_v39 }
 0x1ec   :  { %v697_v43 = vmul.f32 %v965_v41, %v693_v40 }
 0x1ee   :  { %v698_v44 = vsub.f32 %v692_v42, %v697_v43 }
 0x28f   :  { %v568_v55 = vpop.f32.mrf.mxu0 }
 0x290   :  { %v569_v56 = vadd.f32 %v738_v54, %v568_v55 }
 0x291   :  { %v913_v57 = vpop.f32.mrf.mxu0 }
 0x292   :  { %966 = vtanh.f32 %v569_v56 }
 0x29f   :  { %v967_v58 = vpop.eup %966 }
 0x2a0   :  { %947 = vmatmul.mubr.f32.vlgmr.msra.gmra.mxu1 %v967_v58 }
 0x360   :  { %v662_v60 = vpop.f32.mrf.mxu1 }
 0x361   :  { %v663_v61 = vadd.f32 %v739_v59, %v662_v60 }
 0x362   :  { %v948_v62 = vpop.f32.mrf.mxu1 }
 0x363   :  { %v740_v63 = vmul.f32 -1.442695, %v663_v61  ;;  %666 = vst [vmem:[#allocation2] sm:$0xff] %v663_v61 }
 0x365   :  { %968 = vpow2.f32 %v740_v63 }
 0x372   :  { %v969_v1 = vpop.eup %968 }
 0x373   :  { %v670_v0 = vadd.f32 1.0, %v969_v1 }
 0x375   :  { %970 = vrcp.f32 %v670_v0 }
 0x382   :  { %v971_v2 = vpop.eup %970 }
 0x383   :  { %v673_v3 = vsub.f32 %v971_v2, %v1196_v32 }
 0x385   :  { %v674_v4 = vmul.f32 %v673_v3, %v673_v3 }
 0x387   :  { %675 = vadd.xlane.f32.xlu0 %v674_v4 }
 0x38b   :  { %699 = vadd.xlane.f32.xlu0 %v698_v44 }
 0x38c   :  { %983 = shalt.err (!%p980_p4)
}
 0x38d   :  { %727 = dma.vmem_to_hbm [thread:$0]  %s725_s13, 128, %s1594_s15, [#allocation3]   ;;  %v711_v20 = vand.u32 127, %v184_v7 }
 0x38f   :  { %vm712_vm1 = vcmp.eq.s32.totalorder %v711_v20, 0  ;;  %vm714_vm2 = vcmp.eq.s32.totalorder %v711_v20, 1 }
 0x410   :  { %v676_v5 = vpop.xlane.xlu0 %675 }
 0x411   :  { %v677_v6 = vrot.slane %v676_v5, 4 }
 0x413   :  { %v678_v32 = vadd.f32 %v677_v6, %v676_v5 }
 0x414   :  { %v700_v8 = vpop.xlane.xlu0 %699 }
 0x415   :  { %v679_v9 = vrot.slane %v678_v32, 2  ;;  %v701_v10 = vrot.slane %v700_v8, 4 }
 0x417   :  { %v702_v11 = vadd.f32 %v701_v10, %v700_v8  ;;  %v680_v12 = vadd.f32 %v679_v9, %v678_v32 }
 0x419   :  { %v703_v13 = vrot.slane %v702_v11, 2  ;;  %v681_v14 = vrot.slane %v680_v12, 1 }
 0x41b   :  { %v704_v15 = vadd.f32 %v703_v13, %v702_v11  ;;  %v682_v16 = vadd.f32 %v681_v14, %v680_v12 }
 0x41d   :  { %949 = vpush %v682_v16  ;;  %v705_v17 = vrot.slane %v704_v15, 1 }
 0x41f   :  { %v706_v18 = vadd.f32 %v705_v17, %v704_v15 }
 0x421   :  { %951 = vpush %v706_v18 }
 0x44e   :  { %s950_s18 = spop %949 }
 0x44f   :  { %v684_v19 = vstv %s950_s18 }
 0x450   :  { %v685_v21 = vmul.f32 0.125, %v684_v19 }
 0x452   :  { %s952_s15 = spop %951  ;;  %v713_v24 = vsel %vm712_vm1, %v685_v21, 0.0 }
 0x453   :  { %v708_v22 = vstv %s952_s15 }
 0x454   :  { %v709_v23 = vmul.f32 -0.0625, %v708_v22 }
 0x456   :  { %v715_v25 = vsel %vm714_vm2, %v709_v23, 0.0 }
 0x457   :  { %v716_v26 = vadd.f32 %v715_v25, %v713_v24 }
 0x459   :  { %717 = vst [vmem:[%s1595_s16] sm:$0x1] %v716_v26 }
 0x45a   :  { %992 = dma.done.wait [#allocation3], 128  }
 0x45b   :  { %993 = vsyncadd [#allocation3], 4294967168 }
 0x45c   :  { %735 = vsyncpa [#allocation3], 1 }

</bundles_post_ra>
